<compile_context>
chip_gen: v5e
topology: v5e:2x2
jax: 0.10.0
libtpu: 0.0.40
codegen_flags: <defaults>
</compile_context>

<pallas_src>
import jax
import jax.numpy as jnp
import numpy as np
from jax import lax
from jax.experimental import pallas as pl
from jax.experimental.pallas import tpu as pltpu

LANE = 128
SUBLANE = 8


def _round_up(x, m):
    return ((x + m - 1) // m) * m


def _largest_divisor_leq(n, cap):
    cap = max(1, min(n, cap))
    for d in range(cap, 0, -1):
        if n % d == 0:
            return d
    return 1


# ----------------------------------------------------------------------------
# Pallas kernels
# ----------------------------------------------------------------------------
def onehot_gates_kernel(idx_ref, table_ref, b_ref, out_ref):
    """Fused embedding lookup + LSTM input projection for BOTH directions.

    idx_ref:   (NB, 1)  int32 token ids (time-major, batch-padded)
    table_ref: (Vp, 8Hp) f32  embedding table pre-folded with [W_ih_fwd | W_ih_bwd]
    b_ref:     (1, 8Hp)  f32  (b_ih + b_hh) for both directions
    out_ref:   (NB, 8Hp) f32  precomputed input gates
    """
    # TODO(synk): for vocab sizes >> 128, replace the one-hot matmul with a
    # scalar-prefetch row gather (pl.Element) instead.
    nb = idx_ref.shape[0]
    vp = table_ref.shape[0]
    ids = idx_ref[...]                                          # (NB, 1)
    onehot = (lax.broadcasted_iota(jnp.int32, (nb, vp), 1) == ids).astype(jnp.float32)
    out_ref[...] = (jnp.dot(onehot, table_ref[...],
                            preferred_element_type=jnp.float32) + b_ref[...])


def dense_bias_kernel(x_ref, w_ref, b_ref, out_ref):
    """out = x @ W + b  (used for layer>=1 input projections and the final fc)."""
    out_ref[...] = (jnp.dot(x_ref[...], w_ref[...],
                            preferred_element_type=jnp.float32) + b_ref[...])


def bilstm_kernel(gx_ref, whh_ref, out_ref, h_sc, c_sc):
    """Fused bidirectional LSTM recurrence.

    grid = (2, T // TB): axis 0 = direction (parallel), axis 1 = time block (sequential).
    gx_ref:  (TB, Bp, 4Hp) precomputed x @ W_ih + b for this direction / time block
    whh_ref: (Hp, 4Hp)     recurrent weights of this direction (stays VMEM-resident)
    out_ref: (TB, Bp, Hp)  hidden states, written into the fwd/bwd half of (T, Bp, 2Hp)
    h_sc/c_sc: (2, Bp, Hp) per-direction carried state (indexed by direction so that a
                           megacore-parallel direction axis cannot share state).
    """
    d = pl.program_id(0)
    tb = pl.program_id(1)
    TB = gx_ref.shape[0]
    Bp = h_sc.shape[1]
    Hp = h_sc.shape[2]

    @pl.when(tb == 0)
    def _():
        h_sc[d] = jnp.zeros((Bp, Hp), jnp.float32)
        c_sc[d] = jnp.zeros((Bp, Hp), jnp.float32)

    def step(j, carry):
        h, c = carry
        # fwd (d=0) walks the block forward; bwd (d=1) walks it backward.
        i = j + d * (TB - 1 - 2 * j)
        gates = gx_ref[i] + jnp.dot(h, whh_ref[...],
                                    preferred_element_type=jnp.float32)   # (Bp, 4Hp)
        i_g = jax.nn.sigmoid(gates[:, 0 * Hp:1 * Hp])
        f_g = jax.nn.sigmoid(gates[:, 1 * Hp:2 * Hp])
        g_g = jnp.tanh(gates[:, 2 * Hp:3 * Hp])
        o_g = jax.nn.sigmoid(gates[:, 3 * Hp:4 * Hp])
        c = f_g * c + i_g * g_g
        h = o_g * jnp.tanh(c)
        out_ref[i] = h
        return (h, c)

    h_f, c_f = lax.fori_loop(0, TB, step, (h_sc[d], c_sc[d]), unroll=True)
    h_sc[d] = h_f
    c_sc[d] = c_f


# ----------------------------------------------------------------------------
# Wrappers
# ----------------------------------------------------------------------------
def _matmul_bias_pallas(kernel, x, w, b, nb):
    """Row-tiled (N, Din) @ (Din, Dout) + b with weights resident across row blocks."""
    n, din = x.shape
    dout = w.shape[1]
    return pl.pallas_call(
        kernel,
        out_shape=jax.ShapeDtypeStruct((n, dout), jnp.float32),
        grid=(n // nb,),
        in_specs=[
            pl.BlockSpec((nb, din), lambda i: (i, 0)),
            pl.BlockSpec((w.shape[0], dout), lambda i: (0, 0)),
            pl.BlockSpec((1, dout), lambda i: (0, 0)),
        ],
        out_specs=pl.BlockSpec((nb, dout), lambda i: (i, 0)),
        compiler_params=pltpu.CompilerParams(dimension_semantics=("parallel",)),
    )(x, w, b)


def bilstm_pallas(gx_tbg, whh_stacked, tb_block):
    """gx_tbg: (T, Bp, 8Hp) input gates for both dirs -> (T, Bp, 2Hp) bidirectional output."""
    T, Bp, G = gx_tbg.shape
    Hp = G // 8
    nTB = T // tb_block

    def gx_map(d, t):
        tblk = t + d * (nTB - 1 - 2 * t)          # fwd: t ; bwd: reversed time blocks
        return (tblk, 0, d)                       # d selects the fwd/bwd 4Hp gate half

    def out_map(d, t):
        tblk = t + d * (nTB - 1 - 2 * t)
        return (tblk, 0, d)                       # d selects the fwd/bwd Hp output half

    return pl.pallas_call(
        bilstm_kernel,
        out_shape=jax.ShapeDtypeStruct((T, Bp, 2 * Hp), jnp.float32),
        grid_spec=pltpu.PrefetchScalarGridSpec(
            num_scalar_prefetch=0,
            grid=(2, nTB),
            in_specs=[
                pl.BlockSpec((tb_block, Bp, 4 * Hp), gx_map),
                pl.BlockSpec((None, Hp, 4 * Hp), lambda d, t: (d, 0, 0)),
            ],
            out_specs=pl.BlockSpec((tb_block, Bp, Hp), out_map),
            scratch_shapes=[
                pltpu.VMEM((2, Bp, Hp), jnp.float32),   # h per direction
                pltpu.VMEM((2, Bp, Hp), jnp.float32),   # c per direction
            ],
        ),
        compiler_params=pltpu.CompilerParams(
            dimension_semantics=("parallel", "arbitrary")),
    )(gx_tbg, whh_stacked)


def protein_folding_forward(indices_bt, packed):
    """Full forward pass of ProteinFoldingModel using Pallas kernels."""
    B, T = indices_bt.shape
    H, Hp, O, Op = packed["H"], packed["Hp"], packed["O"], packed["Op"]
    Bp = _round_up(B, SUBLANE)
    N = T * Bp

    # Time-major, batch-padded token ids (padded rows reuse id 0; sliced off at the end).
    idx = jnp.zeros((T, Bp), jnp.int32).at[:, :B].set(
        jnp.transpose(indices_bt).astype(jnp.int32))
    idx = idx.reshape(N, 1)

    nb = Bp * _largest_divisor_leq(T, max(1, 512 // Bp))   # row block for the matmul kernels
    tb_block = _largest_divisor_leq(T, 16)                 # timesteps per recurrence grid step

    x = None
    for li, layer in enumerate(packed["layers"]):
        if li == 0:
            # Fused embedding + input projection (both directions), one big MXU matmul.
            gx = _matmul_bias_pallas(onehot_gates_kernel, idx,
                                     layer["w_in"], layer["b_in"], nb)
        else:
            gx = _matmul_bias_pallas(dense_bias_kernel, x.reshape(N, 2 * Hp),
                                     layer["w_in"], layer["b_in"], nb)
        # Sequential bidirectional recurrence (input-gate matmul already hoisted out).
        x = bilstm_pallas(gx.reshape(T, Bp, 8 * Hp), layer["whh"], tb_block)

    # Final linear with a lane-dense (128-wide) padded output.
    out = _matmul_bias_pallas(dense_bias_kernel, x.reshape(N, 2 * Hp),
                              packed["fc_w"], packed["fc_b"], nb)
    out = out.reshape(T, Bp, Op)[:, :B, :O]
    return jnp.transpose(out, (1, 0, 2))                   # (B, T, O)


# ----------------------------------------------------------------------------
# Parameter construction (PyTorch-style) and packing into TPU-padded layout
# ----------------------------------------------------------------------------
def make_params(key, vocab_size, embed_dim, hidden_dim, num_layers, output_dim):
    keys = jax.random.split(key, 3 + num_layers * 2)
    scale = 1.0 / np.sqrt(hidden_dim)

    params = {
        "embedding": jax.random.normal(keys[0], (vocab_size, embed_dim), jnp.float32),
    }

    lstm_layers = []
    for layer in range(num_layers):
        d_in = embed_dim if layer == 0 else 2 * hidden_dim
        layer_params = {}
        for di, dname in enumerate(("fwd", "bwd")):
            k = jax.random.split(keys[3 + layer * 2 + di], 4)
            # Stored pre-transposed: wih (D, 4H), whh (H, 4H); gate order i, f, g, o.
            wih = jax.random.uniform(k[0], (d_in, 4 * hidden_dim), jnp.float32, -scale, scale)
            whh = jax.random.uniform(k[1], (hidden_dim, 4 * hidden_dim), jnp.float32,
                                     -scale, scale)
            b_ih = jax.random.uniform(k[2], (4 * hidden_dim,), jnp.float32, -scale, scale)
            b_hh = jax.random.uniform(k[3], (4 * hidden_dim,), jnp.float32, -scale, scale)
            layer_params[dname] = (wih, whh, (b_ih + b_hh).reshape(1, -1))
        lstm_layers.append(layer_params)
    params["lstm"] = lstm_layers

    kfc = jax.random.split(keys[1], 2)
    fc_scale = 1.0 / np.sqrt(2 * hidden_dim)
    params["fc_w_t"] = jax.random.uniform(kfc[0], (2 * hidden_dim, output_dim), jnp.float32,
                                          -fc_scale, fc_scale)
    params["fc_b"] = jax.random.uniform(kfc[1], (output_dim,), jnp.float32,
                                        -fc_scale, fc_scale)
    return params


def _pad_gate_cols(w, H, Hp):
    """(..., 4H) -> (..., 4Hp): each gate's real columns occupy the first H of its Hp slot."""
    lead = w.shape[:-1]
    w4 = w.reshape(lead + (4, H))
    out = jnp.zeros(lead + (4, Hp), w.dtype).at[..., :H].set(w4)
    return out.reshape(lead + (4 * Hp,))


def _pad_bidir_rows(w, H, Hp):
    """(2H, C) -> (2Hp, C): fwd rows at [0:H], bwd rows at [Hp:Hp+H], zeros elsewhere."""
    out = jnp.zeros((2 * Hp,) + w.shape[1:], w.dtype)
    return out.at[:H].set(w[:H]).at[Hp:Hp + H].set(w[H:2 * H])


def _pad_rows_to(w, rp):
    out = jnp.zeros((rp,) + w.shape[1:], w.dtype)
    return out.at[:w.shape[0]].set(w)


def pack_params(params, vocab_size, hidden_dim, output_dim):
    """Pad/fold PyTorch-style params into lane/sublane-dense kernel layout.

    Zero padding is exact: padded gate columns stay at 0 => padded hidden units stay 0
    through the recurrence, and padded weight rows are 0 so they never contribute.
    """
    H = hidden_dim
    Hp = _round_up(H, LANE)
    Op = _round_up(output_dim, LANE)
    Vp = _round_up(vocab_size, SUBLANE)
    emb = params["embedding"]                               # (V, E)

    layers = []
    for li, layer in enumerate(params["lstm"]):
        w_in_dirs, b_dirs, whh_dirs = [], [], []
        for dname in ("fwd", "bwd"):
            wih, whh, b = layer[dname]                      # (Din,4H), (H,4H), (1,4H)
            if li == 0:
                # Fold the embedding into the input projection: one-hot(idx) @ (E @ W_ih).
                w_in = jnp.dot(emb, wih, precision=lax.Precision.HIGHEST)     # (V, 4H)
                w_in = _pad_rows_to(_pad_gate_cols(w_in, H, Hp), Vp)          # (Vp, 4Hp)
            else:
                w_in = _pad_bidir_rows(_pad_gate_cols(wih, H, Hp), H, Hp)     # (2Hp, 4Hp)
            w_in_dirs.append(w_in)
            b_dirs.append(_pad_gate_cols(b, H, Hp))                           # (1, 4Hp)
            whh_dirs.append(_pad_rows_to(_pad_gate_cols(whh, H, Hp), Hp))     # (Hp, 4Hp)
        layers.append({
            "w_in": jnp.concatenate(w_in_dirs, axis=1),     # (Vp or 2Hp, 8Hp)
            "b_in": jnp.concatenate(b_dirs, axis=1),        # (1, 8Hp)
            "whh": jnp.stack(whh_dirs, axis=0),             # (2, Hp, 4Hp)
        })

    fc_w = _pad_bidir_rows(params["fc_w_t"], H, Hp)                            # (2Hp, O)
    fc_w = jnp.zeros((2 * Hp, Op), jnp.float32).at[:, :output_dim].set(fc_w)   # (2Hp, Op)
    fc_b = jnp.zeros((1, Op), jnp.float32).at[0, :output_dim].set(params["fc_b"])

    # TODO(synk): optionally store weights/activations in bf16 on v6e/v7x for ~2x MXU
    # throughput; kept f32 here for exact parity with the f32 reference.
    return {"layers": layers, "fc_w": fc_w, "fc_b": fc_b,
            "H": H, "Hp": Hp, "O": output_dim, "Op": Op}


# ----------------------------------------------------------------------------
# Pure-JAX reference (for correctness check)
# ----------------------------------------------------------------------------
def _lstm_layer_ref(x_tbd, wih, whh, b):
    T, B, _ = x_tbd.shape
    H = whh.shape[0]
    h = jnp.zeros((B, H), jnp.float32)
    c = jnp.zeros((B, H), jnp.float32)
    outs = []
    for t in range(T):
        gates = x_tbd[t] @ wih + h @ whh + b
        i_g = jax.nn.sigmoid(gates[:, 0 * H:1 * H])
        f_g = jax.nn.sigmoid(gates[:, 1 * H:2 * H])
        g_g = jnp.tanh(gates[:, 2 * H:3 * H])
        o_g = jax.nn.sigmoid(gates[:, 3 * H:4 * H])
        c = f_g * c + i_g * g_g
        h = o_g * jnp.tanh(c)
        outs.append(h)
    return jnp.stack(outs)


def forward_ref(indices_bt, params):
    emb = jnp.take(params["embedding"], indices_bt, axis=0)     # (B, T, E)
    x = jnp.transpose(emb, (1, 0, 2))
    for layer in params["lstm"]:
        h_f = _lstm_layer_ref(x, *layer["fwd"])
        h_b = jnp.flip(_lstm_layer_ref(jnp.flip(x, 0), *layer["bwd"]), 0)
        x = jnp.concatenate([h_f, h_b], axis=-1)
    h = jnp.transpose(x, (1, 0, 2))
    return h @ params["fc_w_t"] + params["fc_b"]


# ----------------------------------------------------------------------------
if __name__ == "__main__":
    # Small shapes consistent with the module's forward: x is [batch, seq_len] of indices.
    VOCAB, EMBED, HIDDEN, LAYERS, OUT = 20, 32, 32, 2, 3
    B, T = 2, 8

    key = jax.random.PRNGKey(0)
    k_param, k_data = jax.random.split(key)
    params = make_params(k_param, VOCAB, EMBED, HIDDEN, LAYERS, OUT)
    packed = pack_params(params, VOCAB, HIDDEN, OUT)
    x = jax.random.randint(k_data, (B, T), 0, VOCAB, dtype=jnp.int32)

    out = jax.block_until_ready(protein_folding_forward(x, packed))
    assert out.shape == (B, T, OUT), out.shape

    ref = jax.block_until_ready(forward_ref(x, params))
    np.testing.assert_allclose(np.asarray(out), np.asarray(ref), rtol=1e-4, atol=1e-4)

    print("KERNEL_OK")
</pallas_src>

<mosaic_0001>
module attributes {stable_mosaic.version = 11 : i64} {
  func.func @onehot_gates_kernel(%arg0: i32, %arg1: memref<64x1xi32, #tpu.memory_space<vmem>>, %arg2: memref<24x1024xf32, #tpu.memory_space<vmem>>, %arg3: memref<1x1024xf32, #tpu.memory_space<vmem>>, %arg4: memref<64x1024xf32, #tpu.memory_space<vmem>>) attributes {dimension_semantics = [#tpu.dimension_semantics<parallel>], iteration_bounds = array<i64: 1>, scalar_prefetch = 0 : i64, scratch_operands = 0 : i64, tpu.core_type = #tpu.core_type<tc>, window_params = [{transform_indices = @transform_0, window_bounds = array<i64: 64, 1>}, {pipeline_mode = #tpu.pipeline_mode<synchronous>, transform_indices = @transform_1, window_bounds = array<i64: 24, 1024>}, {pipeline_mode = #tpu.pipeline_mode<synchronous>, transform_indices = @transform_2, window_bounds = array<i64: 1, 1024>}, {transform_indices = @transform_3, window_bounds = array<i64: 64, 1024>}]} {
    %c0 = arith.constant 0 : index
    %c0_0 = arith.constant 0 : index
    %0 = vector.load %arg1[%c0, %c0_0] : memref<64x1xi32, #tpu.memory_space<vmem>>, vector<64x1xi32>
    %1 = tpu.iota {dimensions = array<i32: 1>} : vector<64x24xi32>
    %2 = vector.broadcast %0 : vector<64x1xi32> to vector<64x24xi32>
    %3 = arith.cmpi eq, %1, %2 : vector<64x24xi32>
    %4 = arith.extui %3 : vector<64x24xi1> to vector<64x24xi32>
    %5 = arith.sitofp %4 : vector<64x24xi32> to vector<64x24xf32>
    %c0_1 = arith.constant 0 : index
    %c0_2 = arith.constant 0 : index
    %6 = vector.load %arg2[%c0_1, %c0_2] : memref<24x1024xf32, #tpu.memory_space<vmem>>, vector<24x1024xf32>
    %cst = arith.constant dense<0.000000e+00> : vector<64x1024xf32>
    %7 = tpu.matmul %5, %6, %cst {dimension_numbers = #tpu.dot_dimension_numbers<[1], [0], [0], [1], [0, 0, 1, 1], [], []>} : vector<64x24xf32>, vector<24x1024xf32>, vector<64x1024xf32> -> vector<64x1024xf32>
    %c0_3 = arith.constant 0 : index
    %c0_4 = arith.constant 0 : index
    %8 = vector.load %arg3[%c0_3, %c0_4] : memref<1x1024xf32, #tpu.memory_space<vmem>>, vector<1x1024xf32>
    %9 = vector.broadcast %8 : vector<1x1024xf32> to vector<64x1024xf32>
    %10 = arith.addf %7, %9 : vector<64x1024xf32>
    %c0_5 = arith.constant 0 : index
    %c0_6 = arith.constant 0 : index
    %11 = vector.load %arg4[%c0_5, %c0_6] : memref<64x1024xf32, #tpu.memory_space<vmem>>, vector<64x1024xf32>
    tpu.vector_store %arg4[%c0_5, %c0_6], %10 {strides = array<i32>} : memref<64x1024xf32, #tpu.memory_space<vmem>>, vector<64x1024xf32>,
    return
  }
  func.func @transform_0(%arg0: i32) -> (i32, i32) {
    %c0_i32 = arith.constant 0 : i32
    %c0_i32_0 = arith.constant 0 : i32
    return %arg0, %c0_i32 : i32, i32
  }
  func.func @transform_1(%arg0: i32) -> (i32, i32) {
    %c0_i32 = arith.constant 0 : i32
    %c0_i32_0 = arith.constant 0 : i32
    %c0_i32_1 = arith.constant 0 : i32
    return %c0_i32, %c0_i32_0 : i32, i32
  }
  func.func @transform_2(%arg0: i32) -> (i32, i32) {
    %c0_i32 = arith.constant 0 : i32
    %c0_i32_0 = arith.constant 0 : i32
    %c0_i32_1 = arith.constant 0 : i32
    return %c0_i32, %c0_i32_0 : i32, i32
  }
  func.func @transform_3(%arg0: i32) -> (i32, i32) {
    %c0_i32 = arith.constant 0 : i32
    %c0_i32_0 = arith.constant 0 : i32
    return %arg0, %c0_i32 : i32, i32
  }
}

</mosaic_0001>

<bundles_post_ra>
// kernel: tpu_custom_call.1
= control target key start
LH: loop header
LB: loop body
LE: loop exit
PB: predicated region body
PF: predicated region fallthrough
CT: control target
= control target key end

     0   :  { %8 = vsyncpa [#allocation3], 0  ;;  %s939_s0 = inlined_call_operand.vmem [shape: s32[64,1], index: 0, kind: input, shape index: {}]   ;;  %s940_s1 = inlined_call_operand.hbm [shape: f32[24,1024], index: 1, kind: input, shape index: {}]   ;;  %s941_s2 = inlined_call_operand.vmem [shape: f32[1,1024], index: 2, kind: input, shape index: {}]   ;;  %s942_s3 = inlined_call_operand.hbm [shape: f32[64,1024], index: 3, kind: output, shape index: {}]  }
   0x1   :  { %9 = vsyncpa [#allocation4], 0  ;;  %s16_s14 = sshll.u32 %s940_s1, 4  ;;  %s700_s15 = smov [#allocation2]   ;;  %s17_s14 = int_to_ptr.hbm [resolvable:$true] %s16_s14 }
   0x2   :  { %s18_s16 = sshll.u32 %s700_s15, 4  ;;  %s701_s17 = smov 1024   ;;  %s19_s16 = int_to_ptr.vmem [resolvable:$true] %s18_s16 }
   0x3   :  { %s702_s18 = smov 64  }
   0x4   :  { %24 = dma.hbm_to_vmem [thread:$0]  %s17_s14, 3072, %s19_s16, [#allocation3], %s701_s17, %s701_s17, %s702_s18  }
   0x5   :  { %696 = dma.done.wait [#allocation3], 3072  }
   0x6   :  { %697 = vsyncadd [#allocation3], 4294964224  ;;  %v703_v0 = vmov 0   ;;  %v33_v1 = vld [vmem:[%s939_s0 + $0x10] sm:$0xff]  ;;  %v31_v2 = vld [vmem:[%s939_s0] sm:$0xff]  ;;  %v39_v27 = vlaneseq  ;;  %vm131_vm0 = vcmask 195584  }
   0x7   :  { %646 = vset.pattern.permute.xlu1 %v703_v0  ;;  %645 = vset.pattern.permute.xlu0 %v703_v0  ;;  %v35_v3 = vld [vmem:[%s939_s0 + $0x20] sm:$0xff]  ;;  %v106_v5 = vld [vmem:[#allocation2 + $0x88] sm:$0xff]  ;;  %v107_v6 = vld [vmem:[#allocation2 + $0x90] sm:$0xff]  ;;  %v704_v32 = vmov 0.0   ;;  %s554_s11 = sshll.u32 %s942_s3, 4  ;;  %s555_s11 = int_to_ptr.hbm [resolvable:$true] %s554_s11 }
   0x8   :  { %647 = vset.pattern.permute.xlu2 %v703_v0  ;;  %48 = vperm.xlu1 %646, %v33_v1   ;;  %v105_v4 = vld [vmem:[#allocation2 + $0x80] sm:$0xff]  ;;  %v108_v7 = vld [vmem:[#allocation2 + $0x98] sm:$0xff]  ;;  %v98_v9 = vld [vmem:[#allocation2 + $0x48] sm:$0xff]  ;;  %v756_v30 = vand.u32 127, %v39_v27 }
   0x9   :  { %42 = vperm.xlu0 %645, %v31_v2   ;;  %54 = vperm.xlu2 %647, %v35_v3   ;;  %v97_v8 = vld [vmem:[#allocation2 + $0x40] sm:$0xff]  ;;  %v99_v10 = vld [vmem:[#allocation2 + $0x50] sm:$0xff]  ;;  %v100_v11 = vld [vmem:[#allocation2 + $0x58] sm:$0xff] }
   0xa   :  { %169 = vmatpush.msra.mxu0 %v105_v4  ;;  %210 = vmatpush.msra.mxu1 %v106_v5  ;;  %v34_v12 = vld [vmem:[%s939_s0 + $0x18] sm:$0xff]  ;;  %v32_v13 = vld [vmem:[%s939_s0 + $0x8] sm:$0xff]  ;;  %v37_v16 = vld [vmem:[%s939_s0 + $0x30] sm:$0xff] }
   0xb   :  { %251 = vmatpush.msra.mxu2 %v107_v6  ;;  %292 = vmatpush.msra.mxu3 %v108_v7  ;;  %v36_v14 = vld [vmem:[%s939_s0 + $0x28] sm:$0xff]  ;;  %v38_v15 = vld [vmem:[%s939_s0 + $0x38] sm:$0xff]  ;;  %v89_v17 = vld [vmem:[#allocation2] sm:$0xff] }
   0xc   :  { %170 = vmatpush.msra.mxu0 %v97_v8  ;;  %211 = vmatpush.msra.mxu1 %v98_v9  ;;  %v90_v18 = vld [vmem:[#allocation2 + $0x8] sm:$0xff]  ;;  %v91_v19 = vld [vmem:[#allocation2 + $0x10] sm:$0xff]  ;;  %v92_v20 = vld [vmem:[#allocation2 + $0x18] sm:$0xff] }
   0xd   :  { %252 = vmatpush.msra.mxu2 %v99_v10  ;;  %293 = vmatpush.msra.mxu3 %v100_v11  ;;  %v111_v21 = vld [vmem:[#allocation2 + $0xb0] sm:$0xff]  ;;  %v112_v22 = vld [vmem:[#allocation2 + $0xb8] sm:$0xff]  ;;  %v109_v23 = vld [vmem:[#allocation2 + $0xa0] sm:$0xff] }
   0xe   :  { %171 = vmatpush.msra.mxu0 %v89_v17  ;;  %212 = vmatpush.msra.mxu1 %v90_v18  ;;  %v110_v24 = vld [vmem:[#allocation2 + $0xa8] sm:$0xff]  ;;  %v103_v25 = vld [vmem:[#allocation2 + $0x70] sm:$0xff]  ;;  %v104_v26 = vld [vmem:[#allocation2 + $0x78] sm:$0xff] }
   0xf   :  { %253 = vmatpush.msra.mxu2 %v91_v19  ;;  %294 = vmatpush.msra.mxu3 %v92_v20  ;;  %v101_v28 = vld [vmem:[#allocation2 + $0x60] sm:$0xff]  ;;  %v102_v29 = vld [vmem:[#allocation2 + $0x68] sm:$0xff]  ;;  %v95_v37 = vld [vmem:[#allocation2 + $0x30] sm:$0xff] }
  0x10   :  { %51 = vperm.xlu1 %646, %v34_v12   ;;  %333 = vmatpush.msrb.mxu0 %v109_v23  ;;  %v96_v38 = vld [vmem:[#allocation2 + $0x38] sm:$0xff]  ;;  %v93_v40 = vld [vmem:[#allocation2 + $0x20] sm:$0xff]  ;;  %v94_v41 = vld [vmem:[#allocation2 + $0x28] sm:$0xff] }
  0x11   :  { %45 = vperm.xlu0 %645, %v32_v13   ;;  %57 = vperm.xlu2 %647, %v36_v14   ;;  %v839_v52 = vld [vmem:[%s941_s2] sm:$0xff]  ;;  %s705_s2 = smov [#allocation5]  }
  0x12   :  { %415 = vmatpush.msrb.mxu2 %v111_v21  ;;  %456 = vmatpush.msrb.mxu3 %v112_v22  ;;  %v846_v53 = vperm.slane %v839_v52, 0  ;;  %v849_v54 = vperm.slane %v839_v52, 1  ;;  %v854_v59 = vperm.slane %v839_v52, 2  ;;  %v857_v60 = vperm.slane %v839_v52, 3  ;;  %s552_s8 = sshll.u32 %s705_s2, 4  ;;  %s553_s8 = int_to_ptr.vmem [resolvable:$true] %s552_s8 }
  0x13   :  { %374 = vmatpush.msrb.mxu1 %v110_v24  ;;  %334 = vmatpush.msrb.mxu0 %v101_v28 }
  0x14   :  { %416 = vmatpush.msrb.mxu2 %v103_v25  ;;  %457 = vmatpush.msrb.mxu3 %v104_v26 }
  0x15   :  { %375 = vmatpush.msrb.mxu1 %v102_v29  ;;  %335 = vmatpush.msrb.mxu0 %v93_v40 }
  0x16   :  { %417 = vmatpush.msrb.mxu2 %v95_v37  ;;  %458 = vmatpush.msrb.mxu3 %v96_v38 }
  0x17   :  { %376 = vmatpush.msrb.mxu1 %v94_v41 }
  0x18   :  { %63 = vperm.xlu1 %646, %v38_v15  }
  0x19   :  { %60 = vperm.xlu0 %645, %v37_v16  }
  0x63   :  { %v55_v44 = vpop.permute.xlu2 %54 }
  0x64   :  { %vm69_vm5 = vcmp.eq.s32.totalorder %v756_v30, %v55_v44 }
  0x65   :  { %v571_v45 = vsel %vm69_vm5, 1.0, %v704_v32 }
  0x6b   :  { %v58_v46 = vpop.permute.xlu2 %57 }
  0x6c   :  { %vm70_vm6 = vcmp.eq.s32.totalorder %v756_v30, %v58_v46 }
  0x6d   :  { %v572_v47 = vsel %vm70_vm6, 1.0, %v704_v32 }
  0x7a   :  { %v49_v36 = vpop.permute.xlu1 %48 }
  0x7b   :  { %v43_v31 = vpop.permute.xlu0 %42  ;;  %vm67_vm3 = vcmp.eq.s32.totalorder %v756_v30, %v49_v36 }
  0x7c   :  { %vm65_vm1 = vcmp.eq.s32.totalorder %v756_v30, %v43_v31  ;;  %v569_v39 = vsel %vm67_vm3, 1.0, %v704_v32 }
  0x7d   :  { %v759_v33 = vsel %vm65_vm1, 1.0, %v704_v32 }
  0x7e   :  { %575 = vmatmul.msk.f32.vlgmr.msra.gmra.mxu0 %vm131_vm0, %v759_v33  ;;  %583 = vmatmul.msk.f32.vlgmr.msra.gmra.mxu1 %vm131_vm0, %v759_v33 }
  0x7f   :  { %591 = vmatmul.msk.f32.vlgmr.msra.gmra.mxu2 %vm131_vm0, %v759_v33  ;;  %599 = vmatmul.msk.f32.vlgmr.msra.gmra.mxu3 %vm131_vm0, %v759_v33 }
  0x82   :  { %v52_v42 = vpop.permute.xlu1 %51 }
  0x83   :  { %v46_v34 = vpop.permute.xlu0 %45  ;;  %vm68_vm4 = vcmp.eq.s32.totalorder %v756_v30, %v52_v42 }
  0x84   :  { %vm66_vm2 = vcmp.eq.s32.totalorder %v756_v30, %v46_v34  ;;  %v570_v43 = vsel %vm68_vm4, 1.0, %v704_v32 }
  0x85   :  { %v568_v35 = vsel %vm66_vm2, 1.0, %v704_v32 }
  0x86   :  { %576 = vmatmul.msk.f32.gmra.mxu0 %vm131_vm0, %v568_v35  ;;  %584 = vmatmul.msk.f32.gmra.mxu1 %vm131_vm0, %v568_v35 }
  0x87   :  { %592 = vmatmul.msk.f32.gmra.mxu2 %vm131_vm0, %v568_v35  ;;  %600 = vmatmul.msk.f32.gmra.mxu3 %vm131_vm0, %v568_v35 }
  0x8a   :  { %v64_v50 = vpop.permute.xlu1 %63 }
  0x8b   :  { %v61_v48 = vpop.permute.xlu0 %60  ;;  %vm72_vm8 = vcmp.eq.s32.totalorder %v756_v30, %v64_v50 }
  0x8c   :  { %vm71_vm7 = vcmp.eq.s32.totalorder %v756_v30, %v61_v48  ;;  %v574_v51 = vsel %vm72_vm8, 1.0, %v704_v32 }
  0x8d   :  { %v573_v49 = vsel %vm71_vm7, 1.0, %v704_v32 }
  0x8e   :  { %577 = vmatmul.msk.f32.gmra.mxu0 %vm131_vm0, %v569_v39  ;;  %585 = vmatmul.msk.f32.gmra.mxu1 %vm131_vm0, %v569_v39 }
  0x8f   :  { %593 = vmatmul.msk.f32.gmra.mxu2 %vm131_vm0, %v569_v39  ;;  %601 = vmatmul.msk.f32.gmra.mxu3 %vm131_vm0, %v569_v39 }
  0x96   :  { %578 = vmatmul.msk.f32.gmra.mxu0 %vm131_vm0, %v570_v43  ;;  %586 = vmatmul.msk.f32.gmra.mxu1 %vm131_vm0, %v570_v43 }
  0x97   :  { %594 = vmatmul.msk.f32.gmra.mxu2 %vm131_vm0, %v570_v43  ;;  %602 = vmatmul.msk.f32.gmra.mxu3 %vm131_vm0, %v570_v43 }
  0x9e   :  { %579 = vmatmul.msk.f32.gmra.mxu0 %vm131_vm0, %v571_v45  ;;  %587 = vmatmul.msk.f32.gmra.mxu1 %vm131_vm0, %v571_v45 }
  0x9f   :  { %595 = vmatmul.msk.f32.gmra.mxu2 %vm131_vm0, %v571_v45  ;;  %603 = vmatmul.msk.f32.gmra.mxu3 %vm131_vm0, %v571_v45 }
  0xa6   :  { %580 = vmatmul.msk.f32.gmra.mxu0 %vm131_vm0, %v572_v47  ;;  %588 = vmatmul.msk.f32.gmra.mxu1 %vm131_vm0, %v572_v47 }
  0xa7   :  { %596 = vmatmul.msk.f32.gmra.mxu2 %vm131_vm0, %v572_v47  ;;  %604 = vmatmul.msk.f32.gmra.mxu3 %vm131_vm0, %v572_v47 }
  0xae   :  { %581 = vmatmul.msk.f32.gmra.mxu0 %vm131_vm0, %v573_v49  ;;  %589 = vmatmul.msk.f32.gmra.mxu1 %vm131_vm0, %v573_v49 }
  0xaf   :  { %597 = vmatmul.msk.f32.gmra.mxu2 %vm131_vm0, %v573_v49  ;;  %605 = vmatmul.msk.f32.gmra.mxu3 %vm131_vm0, %v573_v49 }
  0xb6   :  { %582 = vmatmul.msk.f32.gmra.mxu0 %vm131_vm0, %v574_v51  ;;  %590 = vmatmul.msk.f32.gmra.mxu1 %vm131_vm0, %v574_v51 }
  0xb7   :  { %598 = vmatmul.msk.f32.gmra.mxu2 %vm131_vm0, %v574_v51  ;;  %606 = vmatmul.msk.f32.gmra.mxu3 %vm131_vm0, %v574_v51 }
  0xbe   :  { %607 = vmatmul.msk.f32.vlgmr.msrb.gmra.mxu0 %vm131_vm0, %v759_v33  ;;  %615 = vmatmul.msk.f32.vlgmr.msrb.gmra.mxu1 %vm131_vm0, %v759_v33 }
  0xbf   :  { %623 = vmatmul.msk.f32.vlgmr.msrb.gmra.mxu2 %vm131_vm0, %v759_v33  ;;  %631 = vmatmul.msk.f32.vlgmr.msrb.gmra.mxu3 %vm131_vm0, %v759_v33 }
  0xc6   :  { %608 = vmatmul.msk.f32.gmra.mxu0 %vm131_vm0, %v568_v35  ;;  %616 = vmatmul.msk.f32.gmra.mxu1 %vm131_vm0, %v568_v35 }
  0xc7   :  { %624 = vmatmul.msk.f32.gmra.mxu2 %vm131_vm0, %v568_v35  ;;  %632 = vmatmul.msk.f32.gmra.mxu3 %vm131_vm0, %v568_v35 }
  0xce   :  { %609 = vmatmul.msk.f32.gmra.mxu0 %vm131_vm0, %v569_v39  ;;  %617 = vmatmul.msk.f32.gmra.mxu1 %vm131_vm0, %v569_v39 }
  0xcf   :  { %625 = vmatmul.msk.f32.gmra.mxu2 %vm131_vm0, %v569_v39  ;;  %633 = vmatmul.msk.f32.gmra.mxu3 %vm131_vm0, %v569_v39 }
  0xd6   :  { %610 = vmatmul.msk.f32.gmra.mxu0 %vm131_vm0, %v570_v43  ;;  %618 = vmatmul.msk.f32.gmra.mxu1 %vm131_vm0, %v570_v43 }
  0xd7   :  { %626 = vmatmul.msk.f32.gmra.mxu2 %vm131_vm0, %v570_v43  ;;  %634 = vmatmul.msk.f32.gmra.mxu3 %vm131_vm0, %v570_v43 }
  0xde   :  { %611 = vmatmul.msk.f32.gmra.mxu0 %vm131_vm0, %v571_v45  ;;  %619 = vmatmul.msk.f32.gmra.mxu1 %vm131_vm0, %v571_v45 }
  0xdf   :  { %627 = vmatmul.msk.f32.gmra.mxu2 %vm131_vm0, %v571_v45  ;;  %635 = vmatmul.msk.f32.gmra.mxu3 %vm131_vm0, %v571_v45 }
  0xe6   :  { %612 = vmatmul.msk.f32.gmra.mxu0 %vm131_vm0, %v572_v47  ;;  %620 = vmatmul.msk.f32.gmra.mxu1 %vm131_vm0, %v572_v47 }
  0xe7   :  { %628 = vmatmul.msk.f32.gmra.mxu2 %vm131_vm0, %v572_v47  ;;  %636 = vmatmul.msk.f32.gmra.mxu3 %vm131_vm0, %v572_v47 }
  0xee   :  { %613 = vmatmul.msk.f32.gmra.mxu0 %vm131_vm0, %v573_v49  ;;  %621 = vmatmul.msk.f32.gmra.mxu1 %vm131_vm0, %v573_v49 }
  0xef   :  { %629 = vmatmul.msk.f32.gmra.mxu2 %vm131_vm0, %v573_v49  ;;  %637 = vmatmul.msk.f32.gmra.mxu3 %vm131_vm0, %v573_v49 }
  0xf6   :  { %614 = vmatmul.msk.f32.gmra.mxu0 %vm131_vm0, %v574_v51  ;;  %622 = vmatmul.msk.f32.gmra.mxu1 %vm131_vm0, %v574_v51 }
  0xf7   :  { %630 = vmatmul.msk.f32.gmra.mxu2 %vm131_vm0, %v574_v51  ;;  %638 = vmatmul.msk.f32.gmra.mxu3 %vm131_vm0, %v574_v51 }
  0xfb   :  { %v173_v55 = vpop.f32.mrf.mxu0  ;;  %v214_v56 = vpop.f32.mrf.mxu1 }
  0xfc   :  { %v174_v57 = vadd.f32 %v173_v55, %v846_v53  ;;  %v215_v58 = vadd.f32 %v214_v56, %v849_v54  ;;  %v888_v56 = vperm.slane %v839_v52, 4 }
  0xfe   :  { %484 = vst [vmem:[#allocation5] sm:$0xff] %v174_v57  ;;  %v891_v57 = vperm.slane %v839_v52, 5 }
  0xff   :  { %485 = vst [vmem:[#allocation5 + $0x8] sm:$0xff] %v215_v58 }
 0x102   :  { %v255_v61 = vpop.f32.mrf.mxu2  ;;  %v296_v62 = vpop.f32.mrf.mxu3 }
 0x103   :  { %v256_v63 = vadd.f32 %v255_v61, %v854_v59  ;;  %v297_v0 = vadd.f32 %v296_v62, %v857_v60  ;;  %v176_v1 = vpop.f32.mrf.mxu0  ;;  %v217_v2 = vpop.f32.mrf.mxu1 }
 0x104   :  { %v177_v3 = vadd.f32 %v176_v1, %v846_v53  ;;  %v218_v4 = vadd.f32 %v217_v2, %v849_v54  ;;  %v898_v2 = vperm.slane %v839_v52, 6 }
 0x105   :  { %486 = vst [vmem:[#allocation5 + $0x10] sm:$0xff] %v256_v63 }
 0x106   :  { %487 = vst [vmem:[#allocation5 + $0x18] sm:$0xff] %v297_v0 }
 0x107   :  { %492 = vst [vmem:[#allocation5 + $0x40] sm:$0xff] %v177_v3  ;;  %v901_v3 = vperm.slane %v839_v52, 7 }
 0x108   :  { %493 = vst [vmem:[#allocation5 + $0x48] sm:$0xff] %v218_v4 }
 0x10a   :  { %v258_v5 = vpop.f32.mrf.mxu2  ;;  %v299_v6 = vpop.f32.mrf.mxu3 }
 0x10b   :  { %v259_v7 = vadd.f32 %v258_v5, %v854_v59  ;;  %v300_v8 = vadd.f32 %v299_v6, %v857_v60  ;;  %v179_v9 = vpop.f32.mrf.mxu0  ;;  %v220_v10 = vpop.f32.mrf.mxu1 }
 0x10c   :  { %v180_v11 = vadd.f32 %v179_v9, %v846_v53  ;;  %v221_v12 = vadd.f32 %v220_v10, %v849_v54 }
 0x10d   :  { %494 = vst [vmem:[#allocation5 + $0x50] sm:$0xff] %v259_v7 }
 0x10e   :  { %495 = vst [vmem:[#allocation5 + $0x58] sm:$0xff] %v300_v8 }
 0x10f   :  { %500 = vst [vmem:[#allocation5 + $0x80] sm:$0xff] %v180_v11 }
 0x110   :  { %501 = vst [vmem:[#allocation5 + $0x88] sm:$0xff] %v221_v12 }
 0x112   :  { %v261_v13 = vpop.f32.mrf.mxu2  ;;  %v302_v14 = vpop.f32.mrf.mxu3 }
 0x113   :  { %v262_v15 = vadd.f32 %v261_v13, %v854_v59  ;;  %v303_v16 = vadd.f32 %v302_v14, %v857_v60  ;;  %v182_v17 = vpop.f32.mrf.mxu0  ;;  %v223_v18 = vpop.f32.mrf.mxu1 }
 0x114   :  { %v183_v19 = vadd.f32 %v182_v17, %v846_v53  ;;  %v224_v20 = vadd.f32 %v223_v18, %v849_v54 }
 0x115   :  { %502 = vst [vmem:[#allocation5 + $0x90] sm:$0xff] %v262_v15 }
 0x116   :  { %503 = vst [vmem:[#allocation5 + $0x98] sm:$0xff] %v303_v16 }
 0x117   :  { %508 = vst [vmem:[#allocation5 + $0xc0] sm:$0xff] %v183_v19 }
 0x118   :  { %509 = vst [vmem:[#allocation5 + $0xc8] sm:$0xff] %v224_v20 }
 0x11a   :  { %v264_v21 = vpop.f32.mrf.mxu2  ;;  %v305_v22 = vpop.f32.mrf.mxu3 }
 0x11b   :  { %v265_v23 = vadd.f32 %v264_v21, %v854_v59  ;;  %v306_v24 = vadd.f32 %v305_v22, %v857_v60  ;;  %v185_v25 = vpop.f32.mrf.mxu0  ;;  %v226_v26 = vpop.f32.mrf.mxu1 }
 0x11c   :  { %v186_v27 = vadd.f32 %v185_v25, %v846_v53  ;;  %v227_v28 = vadd.f32 %v226_v26, %v849_v54 }
 0x11d   :  { %510 = vst [vmem:[#allocation5 + $0xd0] sm:$0xff] %v265_v23 }
 0x11e   :  { %511 = vst [vmem:[#allocation5 + $0xd8] sm:$0xff] %v306_v24 }
 0x11f   :  { %516 = vst [vmem:[#allocation5 + $0x100] sm:$0xff] %v186_v27 }
 0x120   :  { %517 = vst [vmem:[#allocation5 + $0x108] sm:$0xff] %v227_v28 }
 0x122   :  { %v267_v29 = vpop.f32.mrf.mxu2  ;;  %v308_v30 = vpop.f32.mrf.mxu3 }
 0x123   :  { %v268_v31 = vadd.f32 %v267_v29, %v854_v59  ;;  %v309_v32 = vadd.f32 %v308_v30, %v857_v60  ;;  %v188_v33 = vpop.f32.mrf.mxu0  ;;  %v229_v34 = vpop.f32.mrf.mxu1 }
 0x124   :  { %v189_v35 = vadd.f32 %v188_v33, %v846_v53  ;;  %v230_v36 = vadd.f32 %v229_v34, %v849_v54 }
 0x125   :  { %518 = vst [vmem:[#allocation5 + $0x110] sm:$0xff] %v268_v31 }
 0x126   :  { %519 = vst [vmem:[#allocation5 + $0x118] sm:$0xff] %v309_v32 }
 0x127   :  { %524 = vst [vmem:[#allocation5 + $0x140] sm:$0xff] %v189_v35 }
 0x128   :  { %525 = vst [vmem:[#allocation5 + $0x148] sm:$0xff] %v230_v36 }
 0x12a   :  { %v270_v37 = vpop.f32.mrf.mxu2  ;;  %v311_v38 = vpop.f32.mrf.mxu3 }
 0x12b   :  { %v271_v39 = vadd.f32 %v270_v37, %v854_v59  ;;  %v312_v40 = vadd.f32 %v311_v38, %v857_v60  ;;  %v191_v41 = vpop.f32.mrf.mxu0  ;;  %v232_v42 = vpop.f32.mrf.mxu1 }
 0x12c   :  { %v192_v43 = vadd.f32 %v191_v41, %v846_v53  ;;  %v233_v44 = vadd.f32 %v232_v42, %v849_v54 }
 0x12d   :  { %526 = vst [vmem:[#allocation5 + $0x150] sm:$0xff] %v271_v39 }
 0x12e   :  { %527 = vst [vmem:[#allocation5 + $0x158] sm:$0xff] %v312_v40 }
 0x12f   :  { %532 = vst [vmem:[#allocation5 + $0x180] sm:$0xff] %v192_v43 }
 0x130   :  { %533 = vst [vmem:[#allocation5 + $0x188] sm:$0xff] %v233_v44 }
 0x132   :  { %v273_v45 = vpop.f32.mrf.mxu2  ;;  %v314_v46 = vpop.f32.mrf.mxu3 }
 0x133   :  { %v274_v47 = vadd.f32 %v273_v45, %v854_v59  ;;  %v315_v48 = vadd.f32 %v314_v46, %v857_v60  ;;  %v194_v49 = vpop.f32.mrf.mxu0  ;;  %v235_v50 = vpop.f32.mrf.mxu1 }
 0x134   :  { %v195_v51 = vadd.f32 %v194_v49, %v846_v53  ;;  %v236_v55 = vadd.f32 %v235_v50, %v849_v54 }
 0x135   :  { %534 = vst [vmem:[#allocation5 + $0x190] sm:$0xff] %v274_v47 }
 0x136   :  { %535 = vst [vmem:[#allocation5 + $0x198] sm:$0xff] %v315_v48 }
 0x137   :  { %540 = vst [vmem:[#allocation5 + $0x1c0] sm:$0xff] %v195_v51 }
 0x138   :  { %541 = vst [vmem:[#allocation5 + $0x1c8] sm:$0xff] %v236_v55 }
 0x13a   :  { %v276_v58 = vpop.f32.mrf.mxu2  ;;  %v317_v61 = vpop.f32.mrf.mxu3 }
 0x13b   :  { %v277_v62 = vadd.f32 %v276_v58, %v854_v59  ;;  %v318_v63 = vadd.f32 %v317_v61, %v857_v60  ;;  %v337_v0 = vpop.f32.mrf.mxu0  ;;  %v378_v53 = vpop.f32.mrf.mxu1 }
 0x13c   :  { %v338_v54 = vadd.f32 %v337_v0, %v888_v56  ;;  %v379_v1 = vadd.f32 %v378_v53, %v891_v57 }
 0x13d   :  { %542 = vst [vmem:[#allocation5 + $0x1d0] sm:$0xff] %v277_v62 }
 0x13e   :  { %543 = vst [vmem:[#allocation5 + $0x1d8] sm:$0xff] %v318_v63 }
 0x13f   :  { %488 = vst [vmem:[#allocation5 + $0x20] sm:$0xff] %v338_v54 }
 0x140   :  { %489 = vst [vmem:[#allocation5 + $0x28] sm:$0xff] %v379_v1 }
 0x142   :  { %v419_v4 = vpop.f32.mrf.mxu2  ;;  %v460_v59 = vpop.f32.mrf.mxu3 }
 0x143   :  { %v420_v60 = vadd.f32 %v419_v4, %v898_v2  ;;  %v461_v5 = vadd.f32 %v460_v59, %v901_v3  ;;  %v340_v6 = vpop.f32.mrf.mxu0  ;;  %v381_v7 = vpop.f32.mrf.mxu1 }
 0x144   :  { %v341_v8 = vadd.f32 %v340_v6, %v888_v56  ;;  %v382_v9 = vadd.f32 %v381_v7, %v891_v57 }
 0x145   :  { %490 = vst [vmem:[#allocation5 + $0x30] sm:$0xff] %v420_v60 }
 0x146   :  { %491 = vst [vmem:[#allocation5 + $0x38] sm:$0xff] %v461_v5 }
 0x147   :  { %496 = vst [vmem:[#allocation5 + $0x60] sm:$0xff] %v341_v8 }
 0x148   :  { %497 = vst [vmem:[#allocation5 + $0x68] sm:$0xff] %v382_v9 }
 0x14a   :  { %v422_v10 = vpop.f32.mrf.mxu2  ;;  %v463_v52 = vpop.f32.mrf.mxu3 }
 0x14b   :  { %v423_v11 = vadd.f32 %v422_v10, %v898_v2  ;;  %v464_v12 = vadd.f32 %v463_v52, %v901_v3  ;;  %v343_v13 = vpop.f32.mrf.mxu0  ;;  %v384_v14 = vpop.f32.mrf.mxu1 }
 0x14c   :  { %v344_v15 = vadd.f32 %v343_v13, %v888_v56  ;;  %v385_v16 = vadd.f32 %v384_v14, %v891_v57 }
 0x14d   :  { %498 = vst [vmem:[#allocation5 + $0x70] sm:$0xff] %v423_v11 }
 0x14e   :  { %499 = vst [vmem:[#allocation5 + $0x78] sm:$0xff] %v464_v12 }
 0x14f   :  { %504 = vst [vmem:[#allocation5 + $0xa0] sm:$0xff] %v344_v15 }
 0x150   :  { %505 = vst [vmem:[#allocation5 + $0xa8] sm:$0xff] %v385_v16 }
 0x152   :  { %v425_v17 = vpop.f32.mrf.mxu2  ;;  %v466_v18 = vpop.f32.mrf.mxu3 }
 0x153   :  { %v426_v19 = vadd.f32 %v425_v17, %v898_v2  ;;  %v467_v20 = vadd.f32 %v466_v18, %v901_v3  ;;  %v346_v21 = vpop.f32.mrf.mxu0  ;;  %v387_v22 = vpop.f32.mrf.mxu1 }
 0x154   :  { %v347_v23 = vadd.f32 %v346_v21, %v888_v56  ;;  %v388_v24 = vadd.f32 %v387_v22, %v891_v57 }
 0x155   :  { %506 = vst [vmem:[#allocation5 + $0xb0] sm:$0xff] %v426_v19 }
 0x156   :  { %507 = vst [vmem:[#allocation5 + $0xb8] sm:$0xff] %v467_v20 }
 0x157   :  { %512 = vst [vmem:[#allocation5 + $0xe0] sm:$0xff] %v347_v23 }
 0x158   :  { %513 = vst [vmem:[#allocation5 + $0xe8] sm:$0xff] %v388_v24 }
 0x15a   :  { %v428_v25 = vpop.f32.mrf.mxu2  ;;  %v469_v26 = vpop.f32.mrf.mxu3 }
 0x15b   :  { %v429_v27 = vadd.f32 %v428_v25, %v898_v2  ;;  %v470_v28 = vadd.f32 %v469_v26, %v901_v3  ;;  %v349_v29 = vpop.f32.mrf.mxu0  ;;  %v390_v30 = vpop.f32.mrf.mxu1 }
 0x15c   :  { %v350_v31 = vadd.f32 %v349_v29, %v888_v56  ;;  %v391_v32 = vadd.f32 %v390_v30, %v891_v57 }
 0x15d   :  { %514 = vst [vmem:[#allocation5 + $0xf0] sm:$0xff] %v429_v27 }
 0x15e   :  { %515 = vst [vmem:[#allocation5 + $0xf8] sm:$0xff] %v470_v28 }
 0x15f   :  { %520 = vst [vmem:[#allocation5 + $0x120] sm:$0xff] %v350_v31 }
 0x160   :  { %521 = vst [vmem:[#allocation5 + $0x128] sm:$0xff] %v391_v32 }
 0x162   :  { %v431_v33 = vpop.f32.mrf.mxu2  ;;  %v472_v34 = vpop.f32.mrf.mxu3 }
 0x163   :  { %v432_v35 = vadd.f32 %v431_v33, %v898_v2  ;;  %v473_v36 = vadd.f32 %v472_v34, %v901_v3  ;;  %v352_v37 = vpop.f32.mrf.mxu0  ;;  %v393_v38 = vpop.f32.mrf.mxu1 }
 0x164   :  { %v353_v39 = vadd.f32 %v352_v37, %v888_v56  ;;  %v394_v40 = vadd.f32 %v393_v38, %v891_v57 }
 0x165   :  { %522 = vst [vmem:[#allocation5 + $0x130] sm:$0xff] %v432_v35 }
 0x166   :  { %523 = vst [vmem:[#allocation5 + $0x138] sm:$0xff] %v473_v36 }
 0x167   :  { %528 = vst [vmem:[#allocation5 + $0x160] sm:$0xff] %v353_v39 }
 0x168   :  { %529 = vst [vmem:[#allocation5 + $0x168] sm:$0xff] %v394_v40 }
 0x16a   :  { %v434_v41 = vpop.f32.mrf.mxu2  ;;  %v475_v42 = vpop.f32.mrf.mxu3 }
 0x16b   :  { %v435_v43 = vadd.f32 %v434_v41, %v898_v2  ;;  %v476_v44 = vadd.f32 %v475_v42, %v901_v3  ;;  %v355_v45 = vpop.f32.mrf.mxu0  ;;  %v396_v46 = vpop.f32.mrf.mxu1 }
 0x16c   :  { %v356_v47 = vadd.f32 %v355_v45, %v888_v56  ;;  %v397_v48 = vadd.f32 %v396_v46, %v891_v57 }
 0x16d   :  { %530 = vst [vmem:[#allocation5 + $0x170] sm:$0xff] %v435_v43 }
 0x16e   :  { %531 = vst [vmem:[#allocation5 + $0x178] sm:$0xff] %v476_v44 }
 0x16f   :  { %536 = vst [vmem:[#allocation5 + $0x1a0] sm:$0xff] %v356_v47 }
 0x170   :  { %537 = vst [vmem:[#allocation5 + $0x1a8] sm:$0xff] %v397_v48 }
 0x172   :  { %v437_v49 = vpop.f32.mrf.mxu2  ;;  %v478_v50 = vpop.f32.mrf.mxu3 }
 0x173   :  { %v438_v51 = vadd.f32 %v437_v49, %v898_v2  ;;  %v479_v55 = vadd.f32 %v478_v50, %v901_v3  ;;  %v358_v58 = vpop.f32.mrf.mxu0  ;;  %v399_v61 = vpop.f32.mrf.mxu1 }
 0x174   :  { %v359_v62 = vadd.f32 %v358_v58, %v888_v56  ;;  %v400_v63 = vadd.f32 %v399_v61, %v891_v57 }
 0x175   :  { %538 = vst [vmem:[#allocation5 + $0x1b0] sm:$0xff] %v438_v51 }
 0x176   :  { %539 = vst [vmem:[#allocation5 + $0x1b8] sm:$0xff] %v479_v55 }
 0x177   :  { %544 = vst [vmem:[#allocation5 + $0x1e0] sm:$0xff] %v359_v62 }
 0x178   :  { %545 = vst [vmem:[#allocation5 + $0x1e8] sm:$0xff] %v400_v63 }
 0x17a   :  { %v440_v0 = vpop.f32.mrf.mxu2  ;;  %v481_v53 = vpop.f32.mrf.mxu3 }
 0x17b   :  { %v441_v54 = vadd.f32 %v440_v0, %v898_v2  ;;  %v482_v1 = vadd.f32 %v481_v53, %v901_v3 }
 0x17d   :  { %546 = vst [vmem:[#allocation5 + $0x1f0] sm:$0xff] %v441_v54 }
 0x17e   :  { %547 = vst [vmem:[#allocation5 + $0x1f8] sm:$0xff] %v482_v1 }
 0x17f   :  { %560 = dma.vmem_to_hbm [thread:$0]  %s553_s8, 8192, %s555_s11, [#allocation4], %s701_s17, %s701_s17, %s702_s18  }
 0x180   :  { %698 = dma.done.wait [#allocation4], 8192  }
 0x181   :  { %699 = vsyncadd [#allocation4], 4294959104 }
 0x182   :  { %565 = vsyncpa [#allocation3], 1 }
 0x183   :  { %566 = vsyncpa [#allocation4], 1 }

</bundles_post_ra>
